<compile_context>
chip_gen: v5e
topology: v5e:2x2
jax: 0.10.0
libtpu: 0.0.40
codegen_flags: <defaults>
</compile_context>

<pallas_src>
import jax
import jax.numpy as jnp
from jax.experimental import pallas as pl
from jax.experimental.pallas import tpu as pltpu

NUM_FILTERS = 100                     # real filters per conv branch
C_PAD = 128                           # lane-padded filter dim
KERNEL_SIZES = (3, 4, 5)
NUM_BRANCHES = len(KERNEL_SIZES)
FEAT_COLS = NUM_BRANCHES * C_PAD      # 384 pooled-feature width
MAX_K = max(KERNEL_SIZES)             # 5
PAD_T = MAX_K - 1                     # zero rows appended to the time axis

# Per-time-offset weight column groups: offset j is used by every branch with k > j.
OFF_BRANCHES = tuple(tuple(bi for bi, k in enumerate(KERNEL_SIZES) if k > j)
                     for j in range(MAX_K))              # ((0,1,2),(0,1,2),(0,1,2),(1,2),(2,))
OFF_NCOLS = tuple(len(bs) * C_PAD for bs in OFF_BRANCHES)  # (384, 384, 384, 256, 128)
OFF_STARTS = tuple(sum(OFF_NCOLS[:j]) for j in range(MAX_K))
W_COLS = sum(OFF_NCOLS)               # 1536


def cnn_kernel(emb_ref,               # (TB, T+4, E) f32   zero-padded along time
               w_ref,                 # (E, 1536)    bf16  per-offset grouped conv weights
               b_ref,                 # (1, 384)     f32   per-branch bias (padded cols = 0)
               fcw_ref,               # (1, 384)     f32   fc weights (padded rows = 0)
               fcb_ref,               # (1, 1)       f32   fc bias (SMEM)
               out_ref):              # (TB, 128)    f32   lane-dense (col 0 = logit)
    TB, T_pad, E = emb_ref.shape
    T = T_pad - PAD_T

    emb_f32 = emb_ref[...]            # single VMEM load; bf16 cast happens in-kernel below

    # Per-branch f32 conv accumulators over the full T rows; rows t >= T-k+1 only
    # see padded zeros and are masked to -inf before the time max.
    accs = [jnp.zeros((TB, T, C_PAD), jnp.float32) for _ in KERNEL_SIZES]

    for j in range(MAX_K):            # static: unrolled
        # Shifted LHS: rows [j, j+T) of the padded block (always in range).
        lhs = emb_f32[:, j:j + T, :].astype(jnp.bfloat16).reshape(TB * T, E)
        c0, nj = OFF_STARTS[j], OFF_NCOLS[j]
        z = jnp.dot(lhs, w_ref[:, c0:c0 + nj],
                    preferred_element_type=jnp.float32).reshape(TB, T, nj)
        for pos, bi in enumerate(OFF_BRANCHES[j]):        # 128-aligned column slices
            accs[bi] = accs[bi] + z[:, :, pos * C_PAD:(pos + 1) * C_PAD]

    # Max over valid time rows, then (hoisted) bias + ReLU:
    #   max_t relu(conv_t + b) == relu(max_t conv_t + b)   (both monotonic).
    t_idx = jax.lax.broadcasted_iota(jnp.int32, (TB, T, C_PAD), 1)
    pooled = []
    for bi, k in enumerate(KERNEL_SIZES):
        valid = t_idx < (T - k + 1)
        m = jnp.max(jnp.where(valid, accs[bi], -jnp.inf), axis=1)      # (TB, 128)
        bias = b_ref[:, bi * C_PAD:(bi + 1) * C_PAD]                   # (1, 128)
        pooled.append(jnp.maximum(m + bias, 0.0))
    feat = jnp.concatenate(pooled, axis=-1)                            # (TB, 384)

    # TODO(synk): nn.Dropout(0.5) is identity in eval mode; training-mode RNG
    # masking is intentionally not applied here.
    # Linear(300 -> 1) as VPU multiply + lane reduction (avoids an N=1 MXU pass).
    logit = jnp.sum(feat * fcw_ref[...], axis=-1, keepdims=True) + fcb_ref[0, 0]
    out_ref[...] = jnp.broadcast_to(logit, (TB, C_PAD))                # lane-dense store


def _pick_tile_b(B, T_pad, E, budget_bytes=24 << 20):
    """Size the batch tile from a VMEM budget; keep >= 2 grid steps when possible."""
    if B <= 8:
        return B
    T = T_pad - PAD_T
    per_row = (3 * T * C_PAD * 4          # f32 branch accumulators
               + T * FEAT_COLS * 4        # largest per-offset product
               + 2 * T_pad * E * 4        # double-buffered f32 emb input block
               + 2 * C_PAD * 4)           # output block
    tb = budget_bytes // per_row
    tb = min(tb, 256)                     # amortize ~0.35us/step without huge steps
    tb = min(tb, (B + 1) // 2)            # >= 2 grid steps -> v7x megacore can split the batch
    tb = max(8, (tb // 8) * 8)            # sublane-aligned output blocks
    return int(min(tb, B))


def cnn_forward(emb, w_off, b_all, fcw_all, fc_b, *, tile_b=None,
                vmem_limit_bytes=40 * 1024 * 1024):
    """emb: (B, T, E) float32 embedded tokens.  Returns (B, 1) logits."""
    B, T, E = emb.shape
    assert T >= MAX_K, f"sequence length must be >= {MAX_K}"

    # Zero-pad the time axis so every offset window is a fixed-length, in-range
    # load.  Under jit this pad fuses with the embedding gather (or pad the token
    # ids with pad_idx before the lookup); padded rows only feed masked positions.
    emb_pad = jnp.pad(emb, ((0, 0), (0, PAD_T), (0, 0)))
    T_pad = T + PAD_T

    if tile_b is None:
        tile_b = _pick_tile_b(B, T_pad, E)
    grid = (pl.cdiv(B, tile_b),)

    out = pl.pallas_call(
        cnn_kernel,
        out_shape=jax.ShapeDtypeStruct((B, C_PAD), jnp.float32),
        grid=grid,
        in_specs=[
            pl.BlockSpec((tile_b, T_pad, E), lambda i: (i, 0, 0)),
            pl.BlockSpec((E, W_COLS), lambda i: (0, 0)),
            pl.BlockSpec((1, FEAT_COLS), lambda i: (0, 0)),
            pl.BlockSpec((1, FEAT_COLS), lambda i: (0, 0)),
            pl.BlockSpec(memory_space=pltpu.MemorySpace.SMEM),   # fc bias scalar
        ],
        out_specs=pl.BlockSpec((tile_b, C_PAD), lambda i: (i, 0)),
        compiler_params=pltpu.CompilerParams(
            dimension_semantics=("parallel",),
            vmem_limit_bytes=vmem_limit_bytes),
    )(emb_pad, w_off, b_all, fcw_all, fc_b)
    return out[:, :1]                                            # (B, 1)


def make_params(key, vocab_size, embedding_dim, pad_idx):
    """PyTorch-equivalent (unpadded) parameters."""
    ks = jax.random.split(key, 9)
    emb_table = jax.random.normal(ks[0], (vocab_size, embedding_dim), jnp.float32)
    emb_table = emb_table.at[pad_idx].set(0.0)

    def conv_wb(kw, kb, k):
        # Conv2d weight (100, 1, k, E) stored transposed as (k*E, 100); row block
        # j*E:(j+1)*E is the kernel slab for sequence offset j.
        fan_in = k * embedding_dim
        bound = 1.0 / jnp.sqrt(fan_in)
        w = jax.random.uniform(kw, (k * embedding_dim, NUM_FILTERS),
                               jnp.float32, -bound, bound)
        b = jax.random.uniform(kb, (NUM_FILTERS,), jnp.float32, -bound, bound)
        return w, b

    w3, b3 = conv_wb(ks[1], ks[2], 3)
    w4, b4 = conv_wb(ks[3], ks[4], 4)
    w5, b5 = conv_wb(ks[5], ks[6], 5)

    fan_in = 3 * NUM_FILTERS
    bound = 1.0 / jnp.sqrt(fan_in)
    fc_w = jax.random.uniform(ks[7], (3 * NUM_FILTERS, 1), jnp.float32, -bound, bound)
    fc_b = jax.random.uniform(ks[8], (1, 1), jnp.float32, -bound, bound)
    return emb_table, w3, b3, w4, b4, w5, b5, fc_w, fc_b


def pack_params(embedding_dim, w3, b3, w4, b4, w5, b5, fc_w, fc_b):
    """Fuse + lane-pad the conv/fc params for the kernel (exact-result padding).

    Conv weights are grouped BY TIME OFFSET: the columns for offset j hold, for
    every branch with kernel size k > j, that branch's (E, 100) slab for
    sequence offset j, zero-padded to 128 filters.
    """
    E = embedding_dim
    branch_w = (w3, w4, w5)
    w_off = jnp.zeros((E, W_COLS), jnp.float32)
    for j in range(MAX_K):
        for pos, bi in enumerate(OFF_BRANCHES[j]):
            c0 = OFF_STARTS[j] + pos * C_PAD
            w_off = w_off.at[:, c0:c0 + NUM_FILTERS].set(
                branch_w[bi][j * E:(j + 1) * E, :])

    b_all = jnp.zeros((1, FEAT_COLS), jnp.float32)
    fcw_all = jnp.zeros((1, FEAT_COLS), jnp.float32)
    for bi, b in enumerate((b3, b4, b5)):
        b_all = b_all.at[0, bi * C_PAD:bi * C_PAD + NUM_FILTERS].set(b)
        fcw_all = fcw_all.at[0, bi * C_PAD:bi * C_PAD + NUM_FILTERS].set(
            fc_w[bi * NUM_FILTERS:(bi + 1) * NUM_FILTERS, 0])
    # bf16 conv weights feed the MXU; accumulation stays f32 inside the kernel.
    return w_off.astype(jnp.bfloat16), b_all, fcw_all, fc_b


def reference_forward(emb, w3, b3, w4, b4, w5, b5, fc_w, fc_b):
    B, T, E = emb.shape

    def branch(w, b, k):
        L = T - k + 1
        conv = jnp.zeros((B, L, NUM_FILTERS), jnp.float32)
        for j in range(k):
            conv = conv + jnp.einsum('ble,ef->blf', emb[:, j:j + L, :],
                                     w[j * E:(j + 1) * E, :],
                                     preferred_element_type=jnp.float32)
        conv = conv + b[None, None, :]
        return jnp.max(jax.nn.relu(conv), axis=1)

    feat = jnp.concatenate([branch(w3, b3, 3), branch(w4, b4, 4),
                            branch(w5, b5, 5)], axis=-1)
    return feat @ fc_w + fc_b


if __name__ == "__main__":
    key = jax.random.PRNGKey(0)
    k_text, k_params = jax.random.split(key)

    vocab_size, embedding_dim, pad_idx = 50, 32, 0
    batch, seq_len = 2, 16

    text = jax.random.randint(k_text, (batch, seq_len), 0, vocab_size, jnp.int32)
    (emb_table, w3, b3, w4, b4, w5, b5, fc_w, fc_b) = make_params(
        k_params, vocab_size, embedding_dim, pad_idx)

    # Embedding lookup (gather) stays as plain-JAX glue; emb stays f32 here
    # (the bf16 cast happens inside the kernel).
    embedded = jnp.take(emb_table, text, axis=0).astype(jnp.float32)   # (B, T, E)

    w_off, b_all, fcw_all, fcb = pack_params(
        embedding_dim, w3, b3, w4, b4, w5, b5, fc_w, fc_b)

    out = cnn_forward(embedded, w_off, b_all, fcw_all, fcb)
    out = jax.block_until_ready(out)

    # Reference with the same bf16-rounded matmul inputs (kernel accumulates in f32).
    emb_r = embedded.astype(jnp.bfloat16).astype(jnp.float32)
    r = lambda w: w.astype(jnp.bfloat16).astype(jnp.float32)
    ref = reference_forward(emb_r, r(w3), b3, r(w4), b4, r(w5), b5, fc_w, fc_b)

    assert out.shape == (batch, 1), out.shape
    assert jnp.allclose(out, ref, atol=1e-3, rtol=1e-3), (out, ref)
    print("KERNEL_OK")
</pallas_src>

<mosaic_0001>
module attributes {stable_mosaic.version = 11 : i64} {
  func.func @cnn_kernel(%arg0: i32, %arg1: memref<2x20x32xf32, #tpu.memory_space<vmem>>, %arg2: memref<32x1536xbf16, #tpu.memory_space<vmem>>, %arg3: memref<1x384xf32, #tpu.memory_space<vmem>>, %arg4: memref<1x384xf32, #tpu.memory_space<vmem>>, %arg5: memref<1x1xf32, #tpu.memory_space<smem>>, %arg6: memref<2x128xf32, #tpu.memory_space<vmem>>) attributes {dimension_semantics = [#tpu.dimension_semantics<parallel>], iteration_bounds = array<i64: 1>, scalar_prefetch = 0 : i64, scratch_operands = 0 : i64, tpu.core_type = #tpu.core_type<tc>, window_params = [{transform_indices = @transform_0, window_bounds = array<i64: 2, 20, 32>}, {pipeline_mode = #tpu.pipeline_mode<synchronous>, transform_indices = @transform_1, window_bounds = array<i64: 32, 1536>}, {pipeline_mode = #tpu.pipeline_mode<synchronous>, transform_indices = @transform_2, window_bounds = array<i64: 1, 384>}, {pipeline_mode = #tpu.pipeline_mode<synchronous>, transform_indices = @transform_3, window_bounds = array<i64: 1, 384>}, {transform_indices = @transform_4, window_bounds = array<i64: 1, 1>}, {transform_indices = @transform_5, window_bounds = array<i64: 2, 128>}]} {
    %c0 = arith.constant 0 : index
    %c0_0 = arith.constant 0 : index
    %c0_1 = arith.constant 0 : index
    %0 = vector.load %arg1[%c0, %c0_0, %c0_1] : memref<2x20x32xf32, #tpu.memory_space<vmem>>, vector<2x20x32xf32>
    %cst = arith.constant 0.000000e+00 : f32
    %1 = vector.broadcast %cst : f32 to vector<2x16x128xf32>
    %cst_2 = arith.constant 0.000000e+00 : f32
    %2 = vector.broadcast %cst_2 : f32 to vector<2x16x128xf32>
    %cst_3 = arith.constant 0.000000e+00 : f32
    %3 = vector.broadcast %cst_3 : f32 to vector<2x16x128xf32>
    %4 = vector.extract_strided_slice %0 {offsets = [0, 0, 0], sizes = [2, 16, 32], strides = [1, 1, 1]} : vector<2x20x32xf32> to vector<2x16x32xf32>
    %5 = arith.truncf %4 : vector<2x16x32xf32> to vector<2x16x32xbf16>
    %6 = vector.shape_cast %5 : vector<2x16x32xbf16> to vector<32x32xbf16>
    %c0_4 = arith.constant 0 : index
    %c0_5 = arith.constant 0 : index
    %7 = vector.load %arg2[%c0_4, %c0_5] : memref<32x1536xbf16, #tpu.memory_space<vmem>>, vector<32x384xbf16>
    %cst_6 = arith.constant dense<0.000000e+00> : vector<32x384xf32>
    %8 = tpu.matmul %6, %7, %cst_6 {dimension_numbers = #tpu.dot_dimension_numbers<[1], [0], [0], [1], [0, 0, 1, 1], [], []>} : vector<32x32xbf16>, vector<32x384xbf16>, vector<32x384xf32> -> vector<32x384xf32>
    %9 = vector.shape_cast %8 : vector<32x384xf32> to vector<2x16x384xf32>
    %10 = vector.extract_strided_slice %9 {offsets = [0, 0, 0], sizes = [2, 16, 128], strides = [1, 1, 1]} : vector<2x16x384xf32> to vector<2x16x128xf32>
    %11 = arith.addf %1, %10 : vector<2x16x128xf32>
    %12 = vector.extract_strided_slice %9 {offsets = [0, 0, 128], sizes = [2, 16, 128], strides = [1, 1, 1]} : vector<2x16x384xf32> to vector<2x16x128xf32>
    %13 = arith.addf %2, %12 : vector<2x16x128xf32>
    %14 = vector.extract_strided_slice %9 {offsets = [0, 0, 256], sizes = [2, 16, 128], strides = [1, 1, 1]} : vector<2x16x384xf32> to vector<2x16x128xf32>
    %15 = arith.addf %3, %14 : vector<2x16x128xf32>
    %16 = vector.extract_strided_slice %0 {offsets = [0, 1, 0], sizes = [2, 16, 32], strides = [1, 1, 1]} : vector<2x20x32xf32> to vector<2x16x32xf32>
    %17 = arith.truncf %16 : vector<2x16x32xf32> to vector<2x16x32xbf16>
    %18 = vector.shape_cast %17 : vector<2x16x32xbf16> to vector<32x32xbf16>
    %c0_7 = arith.constant 0 : index
    %c384 = arith.constant 384 : index
    %19 = vector.load %arg2[%c0_7, %c384] : memref<32x1536xbf16, #tpu.memory_space<vmem>>, vector<32x384xbf16>
    %cst_8 = arith.constant dense<0.000000e+00> : vector<32x384xf32>
    %20 = tpu.matmul %18, %19, %cst_8 {dimension_numbers = #tpu.dot_dimension_numbers<[1], [0], [0], [1], [0, 0, 1, 1], [], []>} : vector<32x32xbf16>, vector<32x384xbf16>, vector<32x384xf32> -> vector<32x384xf32>
    %21 = vector.shape_cast %20 : vector<32x384xf32> to vector<2x16x384xf32>
    %22 = vector.extract_strided_slice %21 {offsets = [0, 0, 0], sizes = [2, 16, 128], strides = [1, 1, 1]} : vector<2x16x384xf32> to vector<2x16x128xf32>
    %23 = arith.addf %11, %22 : vector<2x16x128xf32>
    %24 = vector.extract_strided_slice %21 {offsets = [0, 0, 128], sizes = [2, 16, 128], strides = [1, 1, 1]} : vector<2x16x384xf32> to vector<2x16x128xf32>
    %25 = arith.addf %13, %24 : vector<2x16x128xf32>
    %26 = vector.extract_strided_slice %21 {offsets = [0, 0, 256], sizes = [2, 16, 128], strides = [1, 1, 1]} : vector<2x16x384xf32> to vector<2x16x128xf32>
    %27 = arith.addf %15, %26 : vector<2x16x128xf32>
    %28 = vector.extract_strided_slice %0 {offsets = [0, 2, 0], sizes = [2, 16, 32], strides = [1, 1, 1]} : vector<2x20x32xf32> to vector<2x16x32xf32>
    %29 = arith.truncf %28 : vector<2x16x32xf32> to vector<2x16x32xbf16>
    %30 = vector.shape_cast %29 : vector<2x16x32xbf16> to vector<32x32xbf16>
    %c0_9 = arith.constant 0 : index
    %c768 = arith.constant 768 : index
    %31 = vector.load %arg2[%c0_9, %c768] : memref<32x1536xbf16, #tpu.memory_space<vmem>>, vector<32x384xbf16>
    %cst_10 = arith.constant dense<0.000000e+00> : vector<32x384xf32>
    %32 = tpu.matmul %30, %31, %cst_10 {dimension_numbers = #tpu.dot_dimension_numbers<[1], [0], [0], [1], [0, 0, 1, 1], [], []>} : vector<32x32xbf16>, vector<32x384xbf16>, vector<32x384xf32> -> vector<32x384xf32>
    %33 = vector.shape_cast %32 : vector<32x384xf32> to vector<2x16x384xf32>
    %34 = vector.extract_strided_slice %33 {offsets = [0, 0, 0], sizes = [2, 16, 128], strides = [1, 1, 1]} : vector<2x16x384xf32> to vector<2x16x128xf32>
    %35 = arith.addf %23, %34 : vector<2x16x128xf32>
    %36 = vector.extract_strided_slice %33 {offsets = [0, 0, 128], sizes = [2, 16, 128], strides = [1, 1, 1]} : vector<2x16x384xf32> to vector<2x16x128xf32>
    %37 = arith.addf %25, %36 : vector<2x16x128xf32>
    %38 = vector.extract_strided_slice %33 {offsets = [0, 0, 256], sizes = [2, 16, 128], strides = [1, 1, 1]} : vector<2x16x384xf32> to vector<2x16x128xf32>
    %39 = arith.addf %27, %38 : vector<2x16x128xf32>
    %40 = vector.extract_strided_slice %0 {offsets = [0, 3, 0], sizes = [2, 16, 32], strides = [1, 1, 1]} : vector<2x20x32xf32> to vector<2x16x32xf32>
    %41 = arith.truncf %40 : vector<2x16x32xf32> to vector<2x16x32xbf16>
    %42 = vector.shape_cast %41 : vector<2x16x32xbf16> to vector<32x32xbf16>
    %c0_11 = arith.constant 0 : index
    %c1152 = arith.constant 1152 : index
    %43 = vector.load %arg2[%c0_11, %c1152] : memref<32x1536xbf16, #tpu.memory_space<vmem>>, vector<32x256xbf16>
    %cst_12 = arith.constant dense<0.000000e+00> : vector<32x256xf32>
    %44 = tpu.matmul %42, %43, %cst_12 {dimension_numbers = #tpu.dot_dimension_numbers<[1], [0], [0], [1], [0, 0, 1, 1], [], []>} : vector<32x32xbf16>, vector<32x256xbf16>, vector<32x256xf32> -> vector<32x256xf32>
    %45 = vector.shape_cast %44 : vector<32x256xf32> to vector<2x16x256xf32>
    %46 = vector.extract_strided_slice %45 {offsets = [0, 0, 0], sizes = [2, 16, 128], strides = [1, 1, 1]} : vector<2x16x256xf32> to vector<2x16x128xf32>
    %47 = arith.addf %37, %46 : vector<2x16x128xf32>
    %48 = vector.extract_strided_slice %45 {offsets = [0, 0, 128], sizes = [2, 16, 128], strides = [1, 1, 1]} : vector<2x16x256xf32> to vector<2x16x128xf32>
    %49 = arith.addf %39, %48 : vector<2x16x128xf32>
    %50 = vector.extract_strided_slice %0 {offsets = [0, 4, 0], sizes = [2, 16, 32], strides = [1, 1, 1]} : vector<2x20x32xf32> to vector<2x16x32xf32>
    %51 = arith.truncf %50 : vector<2x16x32xf32> to vector<2x16x32xbf16>
    %52 = vector.shape_cast %51 : vector<2x16x32xbf16> to vector<32x32xbf16>
    %c0_13 = arith.constant 0 : index
    %c1408 = arith.constant 1408 : index
    %53 = vector.load %arg2[%c0_13, %c1408] : memref<32x1536xbf16, #tpu.memory_space<vmem>>, vector<32x128xbf16>
    %cst_14 = arith.constant dense<0.000000e+00> : vector<32x128xf32>
    %54 = tpu.matmul %52, %53, %cst_14 {dimension_numbers = #tpu.dot_dimension_numbers<[1], [0], [0], [1], [0, 0, 1, 1], [], []>} : vector<32x32xbf16>, vector<32x128xbf16>, vector<32x128xf32> -> vector<32x128xf32>
    %55 = vector.shape_cast %54 : vector<32x128xf32> to vector<2x16x128xf32>
    %56 = arith.addf %49, %55 : vector<2x16x128xf32>
    %57 = tpu.iota {dimensions = array<i32: 1>} : vector<2x16x128xi32>
    %c14_i32 = arith.constant 14 : i32
    %58 = vector.broadcast %c14_i32 : i32 to vector<2x16x128xi32>
    %59 = arith.cmpi slt, %57, %58 : vector<2x16x128xi32>
    %cst_15 = arith.constant 0xFF800000 : f32
    %60 = vector.broadcast %cst_15 : f32 to vector<2x16x128xf32>
    %61 = arith.select %59, %35, %60 : vector<2x16x128xi1>, vector<2x16x128xf32>
    %cst_16 = arith.constant dense<0xFF800000> : vector<2x128xf32>
    %62 = vector.multi_reduction <maximumf>, %61, %cst_16 [1] : vector<2x16x128xf32> to vector<2x128xf32>
    %c0_17 = arith.constant 0 : index
    %c0_18 = arith.constant 0 : index
    %63 = vector.load %arg3[%c0_17, %c0_18] : memref<1x384xf32, #tpu.memory_space<vmem>>, vector<1x128xf32>
    %64 = vector.broadcast %63 : vector<1x128xf32> to vector<2x128xf32>
    %65 = arith.addf %62, %64 : vector<2x128xf32>
    %cst_19 = arith.constant 0.000000e+00 : f32
    %66 = vector.broadcast %cst_19 : f32 to vector<2x128xf32>
    %67 = arith.maximumf %65, %66 : vector<2x128xf32>
    %c13_i32 = arith.constant 13 : i32
    %68 = vector.broadcast %c13_i32 : i32 to vector<2x16x128xi32>
    %69 = arith.cmpi slt, %57, %68 : vector<2x16x128xi32>
    %cst_20 = arith.constant 0xFF800000 : f32
    %70 = vector.broadcast %cst_20 : f32 to vector<2x16x128xf32>
    %71 = arith.select %69, %47, %70 : vector<2x16x128xi1>, vector<2x16x128xf32>
    %cst_21 = arith.constant dense<0xFF800000> : vector<2x128xf32>
    %72 = vector.multi_reduction <maximumf>, %71, %cst_21 [1] : vector<2x16x128xf32> to vector<2x128xf32>
    %c0_22 = arith.constant 0 : index
    %c128 = arith.constant 128 : index
    %73 = vector.load %arg3[%c0_22, %c128] : memref<1x384xf32, #tpu.memory_space<vmem>>, vector<1x128xf32>
    %74 = vector.broadcast %73 : vector<1x128xf32> to vector<2x128xf32>
    %75 = arith.addf %72, %74 : vector<2x128xf32>
    %cst_23 = arith.constant 0.000000e+00 : f32
    %76 = vector.broadcast %cst_23 : f32 to vector<2x128xf32>
    %77 = arith.maximumf %75, %76 : vector<2x128xf32>
    %c12_i32 = arith.constant 12 : i32
    %78 = vector.broadcast %c12_i32 : i32 to vector<2x16x128xi32>
    %79 = arith.cmpi slt, %57, %78 : vector<2x16x128xi32>
    %cst_24 = arith.constant 0xFF800000 : f32
    %80 = vector.broadcast %cst_24 : f32 to vector<2x16x128xf32>
    %81 = arith.select %79, %56, %80 : vector<2x16x128xi1>, vector<2x16x128xf32>
    %cst_25 = arith.constant dense<0xFF800000> : vector<2x128xf32>
    %82 = vector.multi_reduction <maximumf>, %81, %cst_25 [1] : vector<2x16x128xf32> to vector<2x128xf32>
    %c0_26 = arith.constant 0 : index
    %c256 = arith.constant 256 : index
    %83 = vector.load %arg3[%c0_26, %c256] : memref<1x384xf32, #tpu.memory_space<vmem>>, vector<1x128xf32>
    %84 = vector.broadcast %83 : vector<1x128xf32> to vector<2x128xf32>
    %85 = arith.addf %82, %84 : vector<2x128xf32>
    %cst_27 = arith.constant 0.000000e+00 : f32
    %86 = vector.broadcast %cst_27 : f32 to vector<2x128xf32>
    %87 = arith.maximumf %85, %86 : vector<2x128xf32>
    %88 = tpu.concatenate %67, %77, %87 in 1 : vector<2x128xf32>, vector<2x128xf32>, vector<2x128xf32> -> vector<2x384xf32>
    %c0_28 = arith.constant 0 : index
    %c0_29 = arith.constant 0 : index
    %89 = vector.load %arg4[%c0_28, %c0_29] : memref<1x384xf32, #tpu.memory_space<vmem>>, vector<1x384xf32>
    %90 = vector.broadcast %89 : vector<1x384xf32> to vector<2x384xf32>
    %91 = arith.mulf %88, %90 : vector<2x384xf32>
    %cst_30 = arith.constant dense<0.000000e+00> : vector<2xf32>
    %92 = vector.multi_reduction <add>, %91, %cst_30 [1] : vector<2x384xf32> to vector<2xf32>
    %93 = vector.shape_cast %92 : vector<2xf32> to vector<2x1xf32>
    %c0_31 = arith.constant 0 : index
    %c0_32 = arith.constant 0 : index
    %94 = memref.load %arg5[%c0_31, %c0_32] : memref<1x1xf32, #tpu.memory_space<smem>>
    %95 = vector.broadcast %94 : f32 to vector<2x1xf32>
    %96 = arith.addf %93, %95 : vector<2x1xf32>
    %97 = vector.shape_cast %96 : vector<2x1xf32> to vector<2x1xf32>
    %98 = vector.broadcast %97 : vector<2x1xf32> to vector<2x128xf32>
    %c0_33 = arith.constant 0 : index
    %c0_34 = arith.constant 0 : index
    %99 = vector.load %arg6[%c0_33, %c0_34] : memref<2x128xf32, #tpu.memory_space<vmem>>, vector<2x128xf32>
    tpu.vector_store %arg6[%c0_33, %c0_34], %98 {strides = array<i32>} : memref<2x128xf32, #tpu.memory_space<vmem>>, vector<2x128xf32>,
    return
  }
  func.func @transform_0(%arg0: i32) -> (i32, i32, i32) {
    %c0_i32 = arith.constant 0 : i32
    %c0_i32_0 = arith.constant 0 : i32
    %c0_i32_1 = arith.constant 0 : i32
    return %arg0, %c0_i32, %c0_i32_0 : i32, i32, i32
  }
  func.func @transform_1(%arg0: i32) -> (i32, i32) {
    %c0_i32 = arith.constant 0 : i32
    %c0_i32_0 = arith.constant 0 : i32
    %c0_i32_1 = arith.constant 0 : i32
    return %c0_i32, %c0_i32_0 : i32, i32
  }
  func.func @transform_2(%arg0: i32) -> (i32, i32) {
    %c0_i32 = arith.constant 0 : i32
    %c0_i32_0 = arith.constant 0 : i32
    %c0_i32_1 = arith.constant 0 : i32
    return %c0_i32, %c0_i32_0 : i32, i32
  }
  func.func @transform_3(%arg0: i32) -> (i32, i32) {
    %c0_i32 = arith.constant 0 : i32
    %c0_i32_0 = arith.constant 0 : i32
    %c0_i32_1 = arith.constant 0 : i32
    return %c0_i32, %c0_i32_0 : i32, i32
  }
  func.func @transform_4(%arg0: i32) -> (i32, i32) {
    %c0_i32 = arith.constant 0 : i32
    %c0_i32_0 = arith.constant 0 : i32
    %c0_i32_1 = arith.constant 0 : i32
    return %c0_i32, %c0_i32_0 : i32, i32
  }
  func.func @transform_5(%arg0: i32) -> (i32, i32) {
    %c0_i32 = arith.constant 0 : i32
    %c0_i32_0 = arith.constant 0 : i32
    return %arg0, %c0_i32 : i32, i32
  }
}

</mosaic_0001>

<bundles_post_ra>
// kernel: tpu_custom_call.1
= control target key start
LH: loop header
LB: loop body
LE: loop exit
PB: predicated region body
PF: predicated region fallthrough
CT: control target
= control target key end

     0   :  { %11 = vsyncpa [#allocation4], 0  ;;  %s1310_s0 = inlined_call_operand.vmem [shape: f32[2,20,32], index: 0, kind: input, shape index: {}]   ;;  %s1311_s1 = inlined_call_operand.hbm [shape: bf16[32,1536], index: 1, kind: input, shape index: {}]   ;;  %s1312_s2 = inlined_call_operand.vmem [shape: f32[1,384], index: 2, kind: input, shape index: {}]   ;;  %s1313_s3 = inlined_call_operand.vmem [shape: f32[1,384], index: 3, kind: input, shape index: {}]   ;;  %s1314_s4 = inlined_call_operand.<no memory space> [shape: f32[1,1], index: 4, kind: input, shape index: {}]   ;;  %s1315_s5 = inlined_call_operand.hbm [shape: f32[2,128], index: 5, kind: output, shape index: {}]  }
   0x1   :  { %12 = vsyncpa [#allocation5], 0  ;;  %s19_s20 = sshll.u32 %s1311_s1, 4  ;;  %s1022_s21 = smov [#allocation3]   ;;  %s20_s20 = int_to_ptr.hbm [resolvable:$true] %s19_s20 }
   0x2   :  { %s21_s22 = sshll.u32 %s1022_s21, 4  ;;  %s1023_s23 = smov 768   ;;  %s22_s22 = int_to_ptr.vmem [resolvable:$true] %s21_s22 }
   0x3   :  { %s1024_s24 = smov 48  }
   0x4   :  { %27 = dma.hbm_to_vmem [thread:$0]  %s20_s20, 3072, %s22_s22, [#allocation4], %s1023_s23, %s1023_s23, %s1024_s24  }
   0x5   :  { %1018 = dma.done.wait [#allocation4], 3072  }
   0x6   :  { %1019 = vsyncadd [#allocation4], 4294964224  ;;  %v829_v0 = vld [vmem:[#allocation3 + $0x60] sm:$0xf]  ;;  %v943_v1 = vld [vmem:[#allocation3 + $0x8c] sm:$0xf0] }
   0x7   :  { %v942_v2 = vld [vmem:[#allocation3 + $0x64] sm:$0xf]  ;;  %v830_v3 = vor.u32 %v943_v1, %v829_v0  ;;  %v831_v4 = vld [vmem:[#allocation3 + $0x90] sm:$0xf0]  ;;  %v837_v5 = vld [vmem:[#allocation3 + $0x68] sm:$0xf] }
   0x8   :  { %v944_v6 = vld [vmem:[#allocation3 + $0x94] sm:$0xf0]  ;;  %v834_v7 = vor.u32 %v942_v2, %v831_v4  ;;  %v817_v9 = vld [vmem:[#allocation3] sm:$0xf]  ;;  %v940_v10 = vld [vmem:[#allocation3 + $0x2c] sm:$0xf0] }
   0x9   :  { %v838_v8 = vor.u32 %v944_v6, %v837_v5  ;;  %v939_v11 = vld [vmem:[#allocation3 + $0x4] sm:$0xf]  ;;  %vm177_vm0 = vsmask.f32 3328  ;;  %vm178_vm1 = vsmask.f32 7440  ;;  %112 = vmatpush.bf16.msra.mxu0 %v830_v3  ;;  %v818_v12 = vor.u32 %v940_v10, %v817_v9 }
   0xa   :  { %v819_v13 = vld [vmem:[#allocation3 + $0x30] sm:$0xf0]  ;;  %v825_v14 = vld [vmem:[#allocation3 + $0x8] sm:$0xf]  ;;  %v941_v15 = vld [vmem:[#allocation3 + $0x34] sm:$0xf0]  ;;  %131 = vmatpush.bf16.msra.mxu1 %v834_v7 }
   0xb   :  { %150 = vmatpush.bf16.msra.mxu2 %v838_v8  ;;  %v822_v16 = vor.u32 %v939_v11, %v819_v13  ;;  %v826_v17 = vor.u32 %v941_v15, %v825_v14  ;;  %v859_v18 = vld [vmem:[#allocation3 + $0x6c] sm:$0xf]  ;;  %v949_v19 = vld [vmem:[#allocation3 + $0x98] sm:$0xf0]  ;;  %v39_v20 = vld [vmem:[%s1310_s0] sm:$0xff]  ;;  %vm99_vm2 = vcmask 261120  }
   0xc   :  { %v860_v21 = vor.u32 %v949_v19, %v859_v18  ;;  %v40_v22 = vld [vmem:[%s1310_s0 + $0x8] sm:$0xff]  ;;  %v1065_v23 = vpack.c.bf16 %v39_v20, %v39_v20  ;;  %v946_v25 = vld [vmem:[#allocation3 + $0x38] sm:$0xf0]  ;;  %v891_v28 = vld [vmem:[#allocation3 + $0x78] sm:$0xf]  ;;  %vm351_vm4 = vcmask 1042432  }
   0xd   :  { %v847_v24 = vld [vmem:[#allocation3 + $0xc] sm:$0xf]  ;;  %v1067_v26 = vpack.c.bf16 %v40_v22, %v40_v22  ;;  %v955_v29 = vld [vmem:[#allocation3 + $0xa4] sm:$0xf0]  ;;  %v41_v30 = vld [vmem:[%s1310_s0 + $0x10] sm:$0xf]  ;;  %113 = vmatpush.bf16.msra.mxu0 %v818_v12 }
   0xe   :  { %v848_v27 = vor.u32 %v946_v25, %v847_v24  ;;  %286 = vmatpush.bf16.msra.mxu3 %v860_v21  ;;  %v61_v31 = vunpack.c.l.b16 %v1065_v23  ;;  %v892_v32 = vor.u32 %v955_v29, %v891_v28  ;;  %v1073_v33 = vpack.c.bf16 %v41_v30, %v41_v30  ;;  %132 = vmatpush.bf16.msra.mxu1 %v822_v16  ;;  %v954_v39 = vld [vmem:[#allocation3 + $0x7c] sm:$0xf]  ;;  %v893_v40 = vld [vmem:[#allocation3 + $0xa8] sm:$0xf0]  ;;  %v948_v43 = vld [vmem:[#allocation3 + $0x70] sm:$0xf] }
   0xf   :  { %v181_v34 = vshrl.u32 %v1065_v23, 16  ;;  %151 = vmatpush.bf16.msra.mxu2 %v826_v17  ;;  %v62_v35 = vunpack.c.l.b16 %v1067_v26  ;;  %v184_v36 = vshll.u32 %v1065_v23, 16  ;;  %v190_v37 = vshll.u32 %v1067_v26, 16  ;;  %v861_v44 = vld [vmem:[#allocation3 + $0x9c] sm:$0xf0]  ;;  %v42_v51 = vld [vmem:[%s1310_s0 + $0x18] sm:$0xff]  ;;  %vm1102_vm3 = vmor %vm177_vm0, %vm178_vm1 }
  0x10   :  { %v194_v38 = vshrl.u32 %v1067_v26, 16  ;;  %v200_v42 = vshll.u32 %v1073_v33, 16  ;;  %v867_v49 = vld [vmem:[#allocation3 + $0x74] sm:$0xf]  ;;  %v950_v50 = vld [vmem:[#allocation3 + $0xa0] sm:$0xf0]  ;;  %v896_v59 = vor.u32 %v954_v39, %v893_v40  ;;  %v864_v60 = vor.u32 %v948_v43, %v861_v44 }
  0x11   :  { %v183_v41 = vrot.slane %v181_v34, 4  ;;  %v65_v45 = vpack.c.b16 %v62_v35, %v61_v31  ;;  %v186_v46 = vrot.slane %v184_v36, 5  ;;  %v192_v47 = vrot.slane %v190_v37, 5  ;;  %v43_v55 = vld [vmem:[%s1310_s0 + $0x20] sm:$0xff]  ;;  %v879_v56 = vld [vmem:[#allocation3 + $0x18] sm:$0xf] }
  0x12   :  { %v196_v48 = vrot.slane %v194_v38, 4  ;;  %287 = vmatpush.bf16.msra.mxu3 %v848_v27  ;;  %v202_v54 = vrot.slane %v200_v42, 5  ;;  %v952_v57 = vld [vmem:[#allocation3 + $0x44] sm:$0xf0]  ;;  %v868_v61 = vor.u32 %v950_v50, %v867_v49  ;;  %v1109_v1 = vpack.c.bf16 %v42_v51, %v42_v51  ;;  %v951_v2 = vld [vmem:[#allocation3 + $0x1c] sm:$0xf]  ;;  %305 = vmatpush.bf16.msrb.mxu0 %v864_v60 }
  0x13   :  { %426 = vmatpush.bf16.msrb.mxu2 %v892_v32  ;;  %839 = vmatmul.msk.bf16.vlgmr.msra.gmra.mxu0 %vm99_vm2, %v65_v45  ;;  %v187_v52 = vor.u32 %v186_v46, %v183_v41  ;;  %v44_v62 = vld [vmem:[%s1310_s0 + $0x28] sm:$0xf]  ;;  %v1111_v3 = vpack.c.bf16 %v43_v55, %v43_v55  ;;  %v880_v4 = vor.u32 %v952_v57, %v879_v56  ;;  %v881_v6 = vld [vmem:[#allocation3 + $0x48] sm:$0xf0]  ;;  %v945_v7 = vld [vmem:[#allocation3 + $0x10] sm:$0xf] }
  0x14   :  { %841 = vmatmul.msk.bf16.vlgmr.msra.gmra.mxu1 %vm99_vm2, %v65_v45  ;;  %v197_v53 = vor.u32 %v196_v48, %v192_v47  ;;  %843 = vmatmul.msk.bf16.vlgmr.msra.gmra.mxu2 %vm99_vm2, %v65_v45  ;;  %v1113_v5 = vpack.c.bf16 %v44_v62, %v44_v62  ;;  %v849_v8 = vld [vmem:[#allocation3 + $0x3c] sm:$0xf0]  ;;  %v205_v11 = vshrl.u32 %v1109_v1, 16  ;;  %v855_v12 = vld [vmem:[#allocation3 + $0x14] sm:$0xf]  ;;  %v208_v16 = vshll.u32 %v1109_v1, 16 }
  0x15   :  { %v188_v63 = vrot.slane %v187_v52, 4  ;;  %324 = vmatpush.bf16.msrb.mxu1 %v868_v61  ;;  %v947_v13 = vld [vmem:[#allocation3 + $0x40] sm:$0xf0]  ;;  %v214_v18 = vshll.u32 %v1111_v3, 16  ;;  %v218_v19 = vshrl.u32 %v1111_v3, 16  ;;  %v63_v22 = vunpack.c.l.b16 %v1109_v1  ;;  %s1025_s19 = smov [#allocation6]  }
  0x16   :  { %v198_v0 = vrot.slane %v197_v53, 4  ;;  %445 = vmatpush.bf16.msrb.mxu3 %v896_v59  ;;  %v207_v17 = vrot.slane %v205_v11, 4  ;;  %v224_v20 = vshll.u32 %v1113_v5, 16  ;;  %v210_v24 = vrot.slane %v208_v16, 5  ;;  %v959_v27 = vld [vmem:[#allocation3 + $0x88] sm:$0xf] }
  0x17   :  { %v193_v9 = vsel %vm1102_vm3, %v188_v63, %v192_v47  ;;  %427 = vmatpush.bf16.msrb.mxu2 %v880_v4  ;;  %v884_v25 = vor.u32 %v951_v2, %v881_v6  ;;  %v919_v28 = vld [vmem:[#allocation3 + $0xb4] sm:$0xf0]  ;;  %v64_v29 = vunpack.c.l.b16 %v1111_v3  ;;  %v216_v30 = vrot.slane %v214_v18, 5  ;;  %v935_v40 = vld [vmem:[#allocation3 + $0x8c] sm:$0xf]  ;;  %s805_s22 = sshll.u32 %s1315_s5, 4  ;;  %s806_s22 = int_to_ptr.hbm [resolvable:$true] %s805_s22 }
  0x18   :  { %v203_v10 = vsel %vm1102_vm3, %v198_v0, %v202_v54  ;;  %v236_v14 = vunpack.c.l.b16 %v193_v9  ;;  %v220_v31 = vrot.slane %v218_v19, 4  ;;  %v852_v32 = vor.u32 %v945_v7, %v849_v8  ;;  %v962_v41 = vld [vmem:[#allocation3 + $0xb8] sm:$0xf0]  ;;  %v899_v46 = vld [vmem:[#allocation3 + $0x80] sm:$0xf] }
  0x19   :  { %v237_v15 = vunpack.c.l.b16 %v203_v10  ;;  %v211_v35 = vor.u32 %v210_v24, %v207_v17  ;;  %v856_v39 = vor.u32 %v947_v13, %v855_v12  ;;  %v226_v44 = vrot.slane %v224_v20, 5  ;;  %v956_v47 = vld [vmem:[#allocation3 + $0xac] sm:$0xf0]  ;;  %v917_v51 = vld [vmem:[#allocation3 + $0x84] sm:$0xf] }
  0x1a   :  { %v221_v43 = vor.u32 %v220_v31, %v216_v30  ;;  %446 = vmatpush.bf16.msrb.mxu3 %v884_v25  ;;  %306 = vmatpush.bf16.msrb.mxu0 %v852_v32  ;;  %v922_v45 = vor.u32 %v959_v27, %v919_v28  ;;  %v936_v49 = vor.u32 %v962_v41, %v935_v40  ;;  %v960_v52 = vld [vmem:[#allocation3 + $0xb0] sm:$0xf0]  ;;  %v356_v59 = vrot.slane %v1067_v26, 5  ;;  %v957_v62 = vld [vmem:[#allocation3 + $0x28] sm:$0xf] }
  0x1b   :  { %v1126_v21 = vpack.c.b16 %v237_v15, %v236_v14  ;;  %v212_v48 = vrot.slane %v211_v35, 4  ;;  %325 = vmatpush.bf16.msrb.mxu1 %v856_v39  ;;  %v900_v50 = vor.u32 %v956_v47, %v899_v46  ;;  %v66_v53 = vpack.c.b16 %v64_v29, %v63_v22  ;;  %v911_v63 = vld [vmem:[#allocation3 + $0x54] sm:$0xf0]  ;;  %v931_v13 = vld [vmem:[#allocation3 + $0x2c] sm:$0xf] }
  0x1c   :  { %v222_v54 = vrot.slane %v221_v43, 4  ;;  %583 = vmatpush.bf16.msra.mxu2 %v922_v45  ;;  %v918_v55 = vor.u32 %v960_v52, %v917_v51  ;;  %vm352_vm5 = vcmask 1046532   ;;  %v875_v0 = vrot.slane %v1065_v23, 9  ;;  %v961_v14 = vld [vmem:[#allocation3 + $0x58] sm:$0xf0] }
  0x1d   :  { %869 = vmatmul.msk.bf16.vlgmr.msra.gmra.mxu3 %vm99_vm2, %v1126_v21  ;;  %v217_v56 = vsel %vm1102_vm3, %v212_v48, %v216_v30  ;;  %v358_v2 = vrot.slane %v356_v59, 4  ;;  %v359_v58 = vrot.slane %v1073_v33, 5  ;;  %v914_v4 = vor.u32 %v957_v62, %v911_v63  ;;  %vm1150_vm6 = vmor %vm351_vm4, %vm352_vm5  ;;  %v887_v15 = vld [vmem:[#allocation3 + $0x20] sm:$0xf]  ;;  %v953_v22 = vld [vmem:[#allocation3 + $0x4c] sm:$0xf0] }
  0x1e   :  { %655 = vmatpush.bf16.msra.mxu3 %v936_v49  ;;  %464 = vmatpush.bf16.msra.mxu0 %v900_v50  ;;  %v227_v57 = vsel %vm1102_vm3, %v222_v54, %v226_v44  ;;  %v238_v60 = vunpack.c.l.b16 %v217_v56  ;;  %v357_v8 = vsel %vm1150_vm6, %v875_v0, %v356_v59  ;;  %v932_v17 = vor.u32 %v961_v14, %v931_v13  ;;  %v909_v24 = vld [vmem:[#allocation3 + $0x24] sm:$0xf]  ;;  %v958_v25 = vld [vmem:[#allocation3 + $0x50] sm:$0xf0] }
  0x1f   :  { %564 = vmatpush.bf16.msra.mxu1 %v918_v55  ;;  %v239_v61 = vunpack.c.l.b16 %v227_v57  ;;  %v360_v9 = vsel %vm1150_vm6, %v358_v2, %v359_v58  ;;  %v376_v10 = vunpack.c.l.b16 %v357_v8  ;;  %v888_v27 = vor.u32 %v953_v22, %v887_v15 }
  0x20   :  { %584 = vmatpush.bf16.msra.mxu2 %v914_v4  ;;  %v377_v12 = vunpack.c.l.b16 %v360_v9  ;;  %v910_v28 = vor.u32 %v958_v25, %v909_v24  ;;  %v363_v30 = vrot.slane %v1111_v3, 5  ;;  %v609_v31 = vrot.slane %v1067_v26, 6 }
  0x21   :  { %v241_v7 = vpack.c.b16 %v239_v61, %v238_v60  ;;  %v876_v32 = vrot.slane %v1109_v1, 9  ;;  %vm604_vm7 = vcmask 1041408   ;;  %vm605_vm8 = vcmask 1045508  }
  0x22   :  { %656 = vmatpush.bf16.msra.mxu3 %v932_v17  ;;  %v1159_v29 = vpack.c.b16 %v377_v12, %v376_v10  ;;  %465 = vmatpush.bf16.msra.mxu0 %v888_v27  ;;  %v927_v35 = vrot.slane %v1065_v23, 10  ;;  %v365_v39 = vrot.slane %v363_v30, 4  ;;  %v366_v40 = vrot.slane %v1113_v5, 5  ;;  %vm1173_vm9 = vmor %vm604_vm7, %vm605_vm8 }
  0x23   :  { %840 = vmatmul.msk.bf16.gmra.mxu0 %vm99_vm2, %v66_v53  ;;  %565 = vmatpush.bf16.msra.mxu1 %v910_v28  ;;  %v612_v43 = vrot.slane %v1073_v33, 6  ;;  %v364_v48 = vsel %vm1150_vm6, %v876_v32, %v363_v30  ;;  %v492_v51 = vrot.slane %v181_v34, 5  ;;  %v493_v52 = vrot.slane %v184_v36, 6 }
  0x24   :  { %842 = vmatmul.msk.bf16.gmra.mxu1 %vm99_vm2, %v66_v53  ;;  %844 = vmatmul.msk.bf16.gmra.mxu2 %vm99_vm2, %v66_v53  ;;  %v610_v44 = vsel %vm1173_vm9, %v927_v35, %v609_v31  ;;  %v367_v49 = vsel %vm1150_vm6, %v365_v39, %v366_v40  ;;  %v501_v53 = vshrl.u32 %v1073_v33, 16  ;;  %v496_v54 = vrot.slane %v194_v38, 5 }
  0x25   :  { %v625_v46 = vunpack.c.l.b16 %v610_v44  ;;  %v497_v55 = vrot.slane %v190_v37, 6  ;;  %v378_v56 = vunpack.c.l.b16 %v364_v48  ;;  %v379_v57 = vunpack.c.l.b16 %v367_v49 }
  0x26   :  { %v503_v59 = vrot.slane %v501_v53, 5  ;;  %v504_v34 = vrot.slane %v200_v42, 6  ;;  %v494_v36 = vor.u32 %v493_v52, %v492_v51  ;;  %vm489_vm10 = vsmask.f32 2304 }
  0x27   :  { %v498_v60 = vor.u32 %v497_v55, %v496_v54  ;;  %v381_v23 = vpack.c.b16 %v379_v57, %v378_v56  ;;  %vm490_vm11 = vsmask.f32 6416  ;;  %v616_v26 = vrot.slane %v1111_v3, 6 }
  0x28   :  { %v505_v61 = vor.u32 %v504_v34, %v503_v59  ;;  %v495_v37 = vrot.slane %v494_v36, 4  ;;  %v928_v62 = vrot.slane %v1109_v1, 10  ;;  %v619_v33 = vrot.slane %v1113_v5, 6  ;;  %vm1205_vm12 = vmor %vm489_vm10, %vm490_vm11 }
  0x29   :  { %v500_v38 = vrot.slane %v498_v60, 4  ;;  %v618_v63 = vrot.slane %v616_v26, 4  ;;  %v507_v12 = vrot.slane %v205_v11, 5  ;;  %v508_v13 = vrot.slane %v208_v16, 6 }
  0x2a   :  { %v617_v0 = vsel %vm1173_vm9, %v928_v62, %v616_v26  ;;  %v499_v4 = vsel %vm1205_vm12, %v495_v37, %v498_v60  ;;  %v511_v14 = vrot.slane %v218_v19, 5  ;;  %v512_v15 = vrot.slane %v214_v18, 6 }
  0x2b   :  { %v620_v2 = vsel %vm1173_vm9, %v618_v63, %v619_v33  ;;  %v627_v58 = vunpack.c.l.b16 %v617_v0  ;;  %v506_v6 = vsel %vm1205_vm12, %v500_v38, %v505_v61  ;;  %v526_v9 = vunpack.c.l.b16 %v499_v4 }
  0x2c   :  { %v527_v10 = vunpack.c.l.b16 %v506_v6  ;;  %v516_v17 = vshrl.u32 %v1113_v5, 16  ;;  %v509_v24 = vor.u32 %v508_v13, %v507_v12  ;;  %v513_v25 = vor.u32 %v512_v15, %v511_v14 }
  0x2d   :  { %870 = vmatmul.msk.bf16.gmra.mxu3 %vm99_vm2, %v241_v7  ;;  %v519_v11 = vrot.slane %v224_v20, 6  ;;  %v672_v54 = vlaneseq  ;;  %vm762_vm15 = vcmask 1041409  }
  0x2e   :  { %v530_v22 = vpack.c.b16 %v527_v10, %v526_v9  ;;  %v518_v27 = vrot.slane %v516_v17, 5  ;;  %v510_v1 = vrot.slane %v509_v24, 4  ;;  %v515_v16 = vrot.slane %v513_v25, 4 }
  0x2f   :  { %v673_v57 = vshrl.u32 %v672_v54, 7 }
  0x30   :  { %v520_v3 = vor.u32 %v519_v11, %v518_v27  ;;  %v514_v18 = vsel %vm1205_vm12, %v510_v1, %v513_v25 }
  0x31   :  { %v528_v28 = vunpack.c.l.b16 %v514_v18  ;;  %v1256_v60 = vadd.s32 8, %v673_v57 }
  0x32   :  { %v521_v19 = vsel %vm1205_vm12, %v515_v16, %v520_v3 }
  0x33   :  { %871 = vmatmul.msk.bf16.vlgmr.msrb.gmra.mxu0 %vm99_vm2, %v1126_v21  ;;  %v529_v30 = vunpack.c.l.b16 %v521_v19  ;;  %vm676_vm13 = vcmp.lt.s32.totalorder %v1256_v60, 14  ;;  %vm704_vm14 = vcmp.lt.s32.totalorder %v1256_v60, 13  ;;  %vm732_vm0 = vcmp.lt.s32.totalorder %v1256_v60, 12 }
  0x34   :  { %873 = vmatmul.msk.bf16.vlgmr.msrb.gmra.mxu1 %vm99_vm2, %v1126_v21  ;;  %901 = vmatmul.msk.bf16.vlgmr.msrb.gmra.mxu2 %vm99_vm2, %v1159_v29  ;;  %v611_v21 = vrot.slane %v609_v31, 4 }
  0x35   :  { %v531_v5 = vpack.c.b16 %v529_v30, %v528_v28 }
  0x36   :  { %v613_v45 = vsel %vm1173_vm9, %v611_v21, %v612_v43 }
  0x37   :  { %v626_v47 = vunpack.c.l.b16 %v613_v45 }
  0x39   :  { %v629_v50 = vpack.c.b16 %v626_v47, %v625_v46 }
  0x3d   :  { %903 = vmatmul.msk.bf16.vlgmr.msrb.gmra.mxu3 %vm99_vm2, %v1159_v29 }
  0x43   :  { %872 = vmatmul.msk.bf16.gmra.mxu0 %vm99_vm2, %v241_v7 }
  0x44   :  { %874 = vmatmul.msk.bf16.gmra.mxu1 %vm99_vm2, %v241_v7  ;;  %902 = vmatmul.msk.bf16.gmra.mxu2 %vm99_vm2, %v381_v23  ;;  %v628_v7 = vunpack.c.l.b16 %v620_v2 }
  0x46   :  { %v630_v8 = vpack.c.b16 %v628_v7, %v627_v58 }
  0x4d   :  { %904 = vmatmul.msk.bf16.gmra.mxu3 %vm99_vm2, %v381_v23 }
  0x53   :  { %905 = vmatmul.msk.bf16.vlgmr.msra.gmra.mxu0 %vm99_vm2, %v1159_v29 }
  0x54   :  { %923 = vmatmul.msk.bf16.vlgmr.msra.gmra.mxu1 %vm99_vm2, %v530_v22  ;;  %925 = vmatmul.msk.bf16.vlgmr.msra.gmra.mxu2 %vm99_vm2, %v530_v22 }
  0x5d   :  { %937 = vmatmul.msk.bf16.vlgmr.msra.gmra.mxu3 %vm99_vm2, %v629_v50 }
  0x63   :  { %906 = vmatmul.msk.bf16.gmra.mxu0 %vm99_vm2, %v381_v23 }
  0x64   :  { %924 = vmatmul.msk.bf16.gmra.mxu1 %vm99_vm2, %v531_v5  ;;  %926 = vmatmul.msk.bf16.gmra.mxu2 %vm99_vm2, %v531_v5 }
  0x6d   :  { %938 = vmatmul.msk.bf16.gmra.mxu3 %vm99_vm2, %v630_v8 }
  0x90   :  { %v115_v20 = vpop.f32.mrf.mxu0 }
  0x91   :  { %v134_v29 = vpop.f32.mrf.mxu1 }
  0x97   :  { %v1242_v31 = vpop.f32.mrf.mxu2 }
  0x98   :  { %v117_v32 = vpop.f32.mrf.mxu0 }
  0x99   :  { %v136_v35 = vpop.f32.mrf.mxu1 }
  0x9f   :  { %v1244_v40 = vpop.f32.mrf.mxu2 }
  0xa0   :  { %v289_v39 = vpop.f32.mrf.mxu3  ;;  %v120_v21 = vpop.f32.mrf.mxu0 }
  0xa1   :  { %v337_v41 = vadd.f32 %v289_v39, %v115_v20  ;;  %v1246_v43 = vpop.f32.mrf.mxu1 }
  0xa7   :  { %v1248_v45 = vpop.f32.mrf.mxu2 }
  0xa8   :  { %v291_v44 = vpop.f32.mrf.mxu3  ;;  %v122_v47 = vpop.f32.mrf.mxu0 }
  0xa9   :  { %v338_v46 = vadd.f32 %v291_v44, %v117_v32  ;;  %v1250_v48 = vpop.f32.mrf.mxu1  ;;  %v967_v44 = vld [vmem:[%s1312_s2] ss:$0 sm:$0xff] }
  0xaf   :  { %v1252_v50 = vpop.f32.mrf.mxu2 }
  0xb0   :  { %v294_v49 = vpop.f32.mrf.mxu3  ;;  %v308_v52 = vpop.f32.mrf.mxu0 }
  0xb1   :  { %v339_v51 = vadd.f32 %v294_v49, %v120_v21  ;;  %v1254_v53 = vpop.f32.mrf.mxu1  ;;  %v341_v27 = vadd.f32 %v308_v52, %v134_v29 }
  0xb2   :  { %v345_v57 = vadd.f32 %v1254_v53, %v1242_v31 }
  0xb7   :  { %v429_v56 = vpop.f32.mrf.mxu2 }
  0xb8   :  { %v296_v55 = vpop.f32.mrf.mxu3  ;;  %v310_v59 = vpop.f32.mrf.mxu0  ;;  %v477_v38 = vadd.f32 %v429_v56, %v337_v41 }
  0xb9   :  { %v329_v34 = vpop.f32.mrf.mxu1  ;;  %v340_v6 = vadd.f32 %v296_v55, %v122_v47  ;;  %v342_v22 = vadd.f32 %v310_v59, %v136_v35 }
  0xba   :  { %v346_v55 = vadd.f32 %v329_v34, %v1244_v40 }
  0xbf   :  { %v431_v36 = vpop.f32.mrf.mxu2 }
  0xc0   :  { %v448_v23 = vpop.f32.mrf.mxu3  ;;  %v478_v61 = vadd.f32 %v431_v36, %v338_v46  ;;  %v313_v26 = vpop.f32.mrf.mxu0 }
  0xc1   :  { %v1259_v37 = vpop.f32.mrf.mxu1  ;;  %v481_v18 = vadd.f32 %v448_v23, %v341_v27 }
  0xc2   :  { %v678_v62 = vsel %vm676_vm13, %v478_v61, -inf }
  0xc3   :  { %v681_v33 = vmax.f32 %v477_v38, %v678_v62 }
  0xc5   :  { %v682_v2 = vrot.slane %v681_v33, 4 }
  0xc7   :  { %v434_v63 = vpop.f32.mrf.mxu2  ;;  %v683_v4 = vmax.f32 %v681_v33, %v682_v2  ;;  %v343_v33 = vadd.f32 %v313_v26, %v1246_v43 }
  0xc8   :  { %v450_v42 = vpop.f32.mrf.mxu3  ;;  %v315_v58 = vpop.f32.mrf.mxu0  ;;  %v479_v13 = vadd.f32 %v434_v63, %v339_v51 }
  0xc9   :  { %v1263_v0 = vpop.f32.mrf.mxu1  ;;  %v684_v12 = vrot.slane %v683_v4, 2  ;;  %v482_v11 = vadd.f32 %v450_v42, %v342_v22  ;;  %v344_v36 = vadd.f32 %v315_v58, %v1250_v48 }
  0xca   :  { %v348_v27 = vadd.f32 %v1263_v0, %v1252_v50 }
  0xcb   :  { %v685_v24 = vmax.f32 %v683_v4, %v684_v12 }
  0xcd   :  { %v686_v28 = vrot.slane %v685_v24, 1 }
  0xcf   :  { %v436_v8 = vpop.f32.mrf.mxu2  ;;  %v687_v41 = vmax.f32 %v685_v24, %v686_v28 }
  0xd0   :  { %v453_v7 = vpop.f32.mrf.mxu3  ;;  %v480_v9 = vadd.f32 %v436_v8, %v340_v6  ;;  %v467_v17 = vpop.f32.mrf.mxu0 }
  0xd1   :  { %v567_v10 = vpop.f32.mrf.mxu1  ;;  %v699_v52 = vadd.f32 %v967_v44, %v687_v41  ;;  %v485_v61 = vadd.f32 %v467_v17, %v345_v57  ;;  %v483_v53 = vadd.f32 %v453_v7, %v343_v33 }
  0xd2   :  { %v680_v14 = vsel %vm676_vm13, %v480_v9, -inf  ;;  %v596_v20 = vadd.f32 %v567_v10, %v481_v18 }
  0xd3   :  { %v688_v15 = vmax.f32 %v479_v13, %v680_v14  ;;  %v701_v38 = vmax.f32 %v699_v52, 0.0 }
  0xd5   :  { %v689_v25 = vrot.slane %v688_v15, 4 }
  0xd7   :  { %v690_v1 = vmax.f32 %v688_v15, %v689_v25  ;;  %v586_v3 = vpop.f32.mrf.mxu2 }
  0xd8   :  { %v455_v16 = vpop.f32.mrf.mxu3  ;;  %v469_v29 = vpop.f32.mrf.mxu0  ;;  %v600_v4 = vadd.f32 %v586_v3, %v485_v61 }
  0xd9   :  { %v569_v19 = vpop.f32.mrf.mxu1  ;;  %v691_v30 = vrot.slane %v690_v1, 2  ;;  %v486_v23 = vadd.f32 %v469_v29, %v346_v55  ;;  %v484_v2 = vadd.f32 %v455_v16, %v344_v36  ;;  %v347_v16 = vadd.f32 %v1259_v37, %v1248_v45  ;;  %v775_v45 = vld [vmem:[%s1313_s3] sm:$0x7] }
  0xda   :  { %v597_v5 = vadd.f32 %v569_v19, %v482_v11  ;;  %v778_v55 = vperm.slane %v775_v45, 1 }
  0xdb   :  { %v692_v32 = vmax.f32 %v690_v1, %v691_v30 }
  0xdc   :  { %v706_v39 = vsel %vm704_vm14, %v597_v5, -inf }
  0xdd   :  { %v709_v35 = vmax.f32 %v596_v20, %v706_v39  ;;  %v693_v21 = vrot.slane %v692_v32, 1  ;;  %v968_v39 = vld [vmem:[%s1312_s2 + $0x1] ss:$0 sm:$0xff] }
  0xdf   :  { %v694_v46 = vmax.f32 %v692_v32, %v693_v21  ;;  %v588_v49 = vpop.f32.mrf.mxu2  ;;  %v710_v56 = vrot.slane %v709_v35, 4 }
  0xe0   :  { %v658_v47 = vpop.f32.mrf.mxu3  ;;  %v601_v63 = vadd.f32 %v588_v49, %v486_v23  ;;  %v472_v6 = vpop.f32.mrf.mxu0  ;;  %v777_v49 = vperm.slane %v775_v45, 0 }
  0xe1   :  { %v572_v51 = vpop.f32.mrf.mxu1  ;;  %v700_v54 = vadd.f32 %v967_v44, %v694_v46  ;;  %v711_v42 = vmax.f32 %v709_v35, %v710_v56  ;;  %v668_v9 = vadd.f32 %v658_v47, %v600_v4  ;;  %v487_v28 = vadd.f32 %v472_v6, %v347_v16  ;;  %v969_v6 = vld [vmem:[%s1312_s2 + $0x2] ss:$0 sm:$0xff]  ;;  %s803_s2 = sshll.u32 %s1025_s19, 4  ;;  %s804_s2 = int_to_ptr.vmem [resolvable:$true] %s803_s2 }
  0xe2   :  { %v598_v12 = vadd.f32 %v572_v51, %v483_v53 }
  0xe3   :  { %v702_v59 = vmax.f32 %v700_v54, 0.0  ;;  %v712_v10 = vrot.slane %v711_v42, 2 }
  0xe5   :  { %v761_v62 = vrot.slane %v702_v59, 7  ;;  %v713_v15 = vmax.f32 %v711_v42, %v712_v10 }
  0xe7   :  { %v763_v31 = vsel %vm762_vm15, %v761_v62, %v701_v38  ;;  %v591_v48 = vpop.f32.mrf.mxu2  ;;  %v714_v11 = vrot.slane %v713_v15, 1 }
  0xe8   :  { %v660_v40 = vpop.f32.mrf.mxu3  ;;  %v474_v25 = vpop.f32.mrf.mxu0  ;;  %v602_v35 = vadd.f32 %v591_v48, %v487_v28  ;;  %v783_v23 = vmul.f32 %v777_v49, %v763_v31 }
  0xe9   :  { %v669_v34 = vadd.f32 %v660_v40, %v601_v63  ;;  %v574_v8 = vpop.f32.mrf.mxu1  ;;  %v488_v18 = vadd.f32 %v474_v25, %v348_v27  ;;  %v715_v5 = vmax.f32 %v713_v15, %v714_v11 }
  0xea   :  { %v599_v58 = vadd.f32 %v574_v8, %v484_v2  ;;  %v787_v60 = vsel %vm604_vm7, %v783_v23, 0.0  ;;  %v779_v8 = vperm.slane %v775_v45, 2 }
  0xeb   :  { %v734_v43 = vsel %vm732_vm0, %v669_v34, -inf  ;;  %v727_v44 = vadd.f32 %v968_v39, %v715_v5 }
  0xec   :  { %v737_v26 = vmax.f32 %v668_v9, %v734_v43  ;;  %v708_v13 = vsel %vm704_vm14, %v599_v58, -inf }
  0xed   :  { %v716_v14 = vmax.f32 %v598_v12, %v708_v13  ;;  %v729_v56 = vmax.f32 %v727_v44, 0.0 }
  0xee   :  { %v738_v7 = vrot.slane %v737_v26, 4 }
  0xef   :  { %v717_v17 = vrot.slane %v716_v14, 4  ;;  %v593_v3 = vpop.f32.mrf.mxu2 }
  0xf0   :  { %v663_v22 = vpop.f32.mrf.mxu3  ;;  %v739_v30 = vmax.f32 %v737_v26, %v738_v7  ;;  %v603_v32 = vadd.f32 %v593_v3, %v488_v18  ;;  %v795_v26 = vstv %s1314_s4 }
  0xf1   :  { %v718_v24 = vmax.f32 %v716_v14, %v717_v17  ;;  %v670_v21 = vadd.f32 %v663_v22, %v602_v35 }
  0xf2   :  { %v740_v37 = vrot.slane %v739_v30, 2 }
  0xf3   :  { %v719_v1 = vrot.slane %v718_v24, 2 }
  0xf4   :  { %v741_v52 = vmax.f32 %v739_v30, %v740_v37 }
  0xf5   :  { %v720_v19 = vmax.f32 %v718_v24, %v719_v1 }
  0xf6   :  { %v742_v61 = vrot.slane %v741_v52, 1 }
  0xf7   :  { %v721_v20 = vrot.slane %v720_v19, 1 }
  0xf8   :  { %v665_v41 = vpop.f32.mrf.mxu3  ;;  %v743_v2 = vmax.f32 %v741_v52, %v742_v61 }
  0xf9   :  { %v722_v50 = vmax.f32 %v720_v19, %v721_v20  ;;  %v671_v0 = vadd.f32 %v665_v41, %v603_v32 }
  0xfa   :  { %v755_v53 = vadd.f32 %v969_v6, %v743_v2 }
  0xfb   :  { %v736_v29 = vsel %vm732_vm0, %v671_v0, -inf  ;;  %v728_v46 = vadd.f32 %v968_v39, %v722_v50 }
  0xfc   :  { %v744_v47 = vmax.f32 %v670_v21, %v736_v29  ;;  %v757_v9 = vmax.f32 %v755_v53, 0.0 }
  0xfd   :  { %v730_v51 = vmax.f32 %v728_v46, 0.0 }
  0xfe   :  { %v745_v54 = vrot.slane %v744_v47, 4 }
  0xff   :  { %v767_v57 = vrot.slane %v730_v51, 7 }
 0x100   :  { %v746_v59 = vmax.f32 %v744_v47, %v745_v54 }
 0x101   :  { %v768_v36 = vsel %vm762_vm15, %v767_v57, %v729_v56 }
 0x102   :  { %v747_v38 = vrot.slane %v746_v59, 2  ;;  %v784_v62 = vmul.f32 %v778_v55, %v768_v36 }
 0x104   :  { %v748_v33 = vmax.f32 %v746_v59, %v747_v38  ;;  %v788_v42 = vsel %vm604_vm7, %v784_v62, 0.0 }
 0x105   :  { %v789_v63 = vadd.f32 %v788_v42, %v787_v60 }
 0x106   :  { %v749_v4 = vrot.slane %v748_v33, 1 }
 0x108   :  { %v750_v40 = vmax.f32 %v748_v33, %v749_v4 }
 0x10a   :  { %v756_v31 = vadd.f32 %v969_v6, %v750_v40 }
 0x10c   :  { %v758_v34 = vmax.f32 %v756_v31, 0.0 }
 0x10e   :  { %v772_v48 = vrot.slane %v758_v34, 7 }
 0x110   :  { %v773_v58 = vsel %vm762_vm15, %v772_v48, %v757_v9 }
 0x111   :  { %v785_v10 = vmul.f32 %v779_v8, %v773_v58 }
 0x113   :  { %v790_v12 = vsel %vm604_vm7, %v785_v10, 0.0 }
 0x114   :  { %v791_v43 = vadd.f32 %v790_v12, %v789_v63 }
 0x116   :  { %792 = vadd.xlane.f32.xlu0 %v791_v43 }
 0x189   :  { %v793_v13 = vpop.xlane.xlu0 %792 }
 0x18a   :  { %v796_v14 = vadd.f32 %v795_v26, %v793_v13 }
 0x18c   :  { %797 = vst [vmem:[#allocation6] sm:$0x3] %v796_v14 }
 0x18d   :  { %808 = dma.vmem_to_hbm [thread:$0]  %s804_s2, 32, %s806_s22, [#allocation5]  }
 0x18e   :  { %1020 = dma.done.wait [#allocation5], 32  }
 0x18f   :  { %1021 = vsyncadd [#allocation5], 4294967264 }
 0x190   :  { %813 = vsyncpa [#allocation4], 1 }
 0x191   :  { %814 = vsyncpa [#allocation5], 1 }

</bundles_post_ra>
